<compile_context>
chip_gen: v6e
topology: v6e:2x2x1
jax: 0.10.0
libtpu: 0.0.40
codegen_flags: <defaults>
</compile_context>

<pallas_src>
import functools

import numpy as np
import jax
import jax.numpy as jnp
from jax import lax
from jax.experimental import pallas as pl
from jax.experimental.pallas import tpu as pltpu


def _round_up(x, m):
    return ((x + m - 1) // m) * m


def _dot_relu_kernel(k_ref, v_ref,
                     wk1_ref, wk2_ref, wv1_ref, wv2_ref,
                     bk1_ref, bk2_ref, bv1_ref, bv2_ref,
                     o_ref, *, compute_dtype):
    """One grid step = TILE_N rows (all leading dims of k/v flattened).

    k_ref / v_ref : (TILE_N, h) natural-layout activation tiles (original dtype).
    w*_ref        : (h, h) torch nn.Linear weights (out, in), VMEM-resident.
    b*_ref        : (h, 1) f32 biases, VMEM-resident.
    o_ref         : (1, 1, TILE_N) per-row dot products (lane-dense store).
    """

    def mlp2(x_ref, w1_ref, b1_ref, w2_ref, b2_ref):
        # 2-layer ReluBlock, computed in the transposed orientation:
        #   z = W2 @ relu(W1 @ x^T + b1) + b2            -> (h, TILE_N)
        # The x^T is absorbed into the first matmul by contracting on the last
        # dim of BOTH operands (q@k^T pattern) -- no explicit XLU transpose.
        x = x_ref[...].astype(compute_dtype)                       # (TN, h)
        y = lax.dot_general(w1_ref[...], x, (((1,), (1,)), ((), ())),
                            preferred_element_type=jnp.float32)    # (h, TN)
        y = jnp.maximum(y + b1_ref[...], 0.0)                      # f32 bias+relu
        y = y.astype(compute_dtype)                                # back to MXU dtype
        z = jnp.dot(w2_ref[...], y, preferred_element_type=jnp.float32)
        return z + b2_ref[...]                                     # (h, TN) f32

    kq = mlp2(k_ref, wk1_ref, bk1_ref, wk2_ref, bk2_ref)
    vq = mlp2(v_ref, wv1_ref, bv1_ref, wv2_ref, bv2_ref)

    # Feature sum = sublane reduction -> lane-dense (1, TILE_N) vector.
    o_ref[0] = jnp.sum(kq * vq, axis=0, keepdims=True)


def dot_relu_block(k, v, wk1, bk1, wk2, bk2, wv1, bv1, wv2, bv2,
                   *, tile_n=2048, compute_dtype=jnp.bfloat16,
                   vmem_budget_bytes=48 * (1 << 20)):
    """k, v: (..., h).  Weights: (h, h) torch nn.Linear layout (out, in).
    Returns sum(key_mlp(k) * val_mlp(v), -1) with shape k.shape[:-1]."""
    assert k.shape == v.shape
    lead_shape = k.shape[:-1]
    h = k.shape[-1]

    kf = k.reshape(-1, h)
    vf = v.reshape(-1, h)
    n = kf.shape[0]
    if n == 0:  # degenerate edge case: empty input
        return jnp.zeros(lead_shape, k.dtype)

    in_itemsize = jnp.dtype(k.dtype).itemsize
    cd_itemsize = jnp.dtype(compute_dtype).itemsize

    # ---- tile sizing ------------------------------------------------------
    tile_n = _round_up(max(tile_n, 128), 128)
    max_tile = _round_up(n, 128)
    if n > 128:  # keep >= 2 balanced grid steps so both v7x TensorCores work
        max_tile = min(max_tile, _round_up(-(-n // 2), 128))
    tile_n = min(tile_n, max_tile)

    def vmem_need(t):
        act = 2 * 2 * t * h * in_itemsize          # k/v blocks, double-buffered
        outb = 2 * t * 4                           # output block, double-buffered
        wts = 2 * 4 * h * h * cd_itemsize          # resident weights (worst case x2)
        bias = 2 * 4 * max(h, 8) * 128 * 4         # (h,1) f32 biases, lane-padded
        temps = 6 * t * h * 4                      # in-kernel f32/bf16 intermediates
        return act + outb + wts + bias + temps

    while tile_n > 128 and vmem_need(tile_n) > vmem_budget_bytes:
        tile_n -= 128

    num_tiles = -(-n // tile_n)
    n_pad = num_tiles * tile_n
    if n_pad != n:  # only pads when tile_n does not divide n
        kf = jnp.pad(kf, ((0, n_pad - n), (0, 0)))
        vf = jnp.pad(vf, ((0, n_pad - n), (0, 0)))

    vmem_limit = int(min(max(1.25 * vmem_need(tile_n), 32 * (1 << 20)),
                         vmem_budget_bytes))

    # One-time O(h^2) weight/bias prep (negligible vs activation traffic).
    wk1c, wk2c, wv1c, wv2c = (w.astype(compute_dtype)
                              for w in (wk1, wk2, wv1, wv2))
    bk1c, bk2c, bv1c, bv2c = (b.astype(jnp.float32).reshape(h, 1)
                              for b in (bk1, bk2, bv1, bv2))

    kernel = functools.partial(_dot_relu_kernel, compute_dtype=compute_dtype)

    cost = pl.CostEstimate(
        flops=int(8 * h * h * n_pad),
        transcendentals=0,
        bytes_accessed=int(2 * n_pad * h * in_itemsize
                           + 4 * h * h * cd_itemsize + 4 * h * 4 + n_pad * 4))

    def run(weight_pipeline_mode):
        def resident(shape):
            kwargs = {}
            if weight_pipeline_mode is not None:
                kwargs["pipeline_mode"] = weight_pipeline_mode
            return pl.BlockSpec(shape, lambda i: (0,) * len(shape), **kwargs)

        grid_spec = pltpu.PrefetchScalarGridSpec(
            num_scalar_prefetch=0,
            grid=(num_tiles,),
            in_specs=[
                pl.BlockSpec((tile_n, h), lambda i: (i, 0)),   # k rows (natural)
                pl.BlockSpec((tile_n, h), lambda i: (i, 0)),   # v rows (natural)
                resident((h, h)), resident((h, h)),            # key weights
                resident((h, h)), resident((h, h)),            # val weights
                resident((h, 1)), resident((h, 1)),            # key biases
                resident((h, 1)), resident((h, 1)),            # val biases
            ],
            out_specs=pl.BlockSpec((1, 1, tile_n), lambda i: (i, 0, 0)),
        )
        return pl.pallas_call(
            kernel,
            out_shape=jax.ShapeDtypeStruct((num_tiles, 1, tile_n), jnp.float32),
            grid_spec=grid_spec,
            compiler_params=pltpu.CompilerParams(
                dimension_semantics=("parallel",),
                vmem_limit_bytes=vmem_limit),
            cost_estimate=cost,
        )(kf, vf, wk1c, wk2c, wv1c, wv2c, bk1c, bk2c, bv1c, bv2c)

    try:
        # Constant-index weight/bias streams only need one VMEM buffer; drop
        # the redundant double buffer (matters for large h on v7x's 64 MiB).
        out = run(pl.Buffered(1))
    except Exception:
        # JAX versions where pipeline_mode is not honored on pallas_call specs.
        out = run(None)

    out = out.reshape(n_pad)[:n].reshape(lead_shape)
    return out.astype(k.dtype)


def _reference(k, v, wk1, bk1, wk2, bk2, wv1, bv1, wv2, bv2):
    """Plain-JAX (f32) mirror of the PyTorch forward, for verification."""
    def relu_block(x, w1, b1, w2, b2):
        x = x @ w1.T + b1
        x = jnp.maximum(x, 0.0)
        x = x @ w2.T + b2
        return x

    kq = relu_block(k, wk1, bk1, wk2, bk2)
    vq = relu_block(v, wv1, bv1, wv2, bv2)
    return jnp.sum(kq * vq, axis=-1)


if __name__ == "__main__":
    B, T, H = 2, 8, 32   # batch, seq, hidden

    key = jax.random.PRNGKey(0)
    ks = jax.random.split(key, 10)

    k = jax.random.normal(ks[0], (B, T, H), jnp.float32)
    v = jax.random.normal(ks[1], (B, T, H), jnp.float32)

    def init_w(kk):
        return jax.random.normal(kk, (H, H), jnp.float32) * 0.1

    def init_b(kk):
        return jax.random.normal(kk, (H,), jnp.float32) * 0.1

    wk1, wk2, wv1, wv2 = init_w(ks[2]), init_w(ks[3]), init_w(ks[4]), init_w(ks[5])
    bk1, bk2, bv1, bv2 = init_b(ks[6]), init_b(ks[7]), init_b(ks[8]), init_b(ks[9])

    out = dot_relu_block(k, v, wk1, bk1, wk2, bk2, wv1, bv1, wv2, bv2)
    out = jax.block_until_ready(out)

    ref = _reference(k, v, wk1, bk1, wk2, bk2, wv1, bv1, wv2, bv2)
    # bf16 MXU operands with f32 accumulation -> small relative error.
    np.testing.assert_allclose(np.asarray(out), np.asarray(ref),
                               rtol=3e-2, atol=3e-2)
    print("KERNEL_OK")
</pallas_src>

<mosaic_0001>
module attributes {stable_mosaic.version = 11 : i64} {
  func.func @_dot_relu_kernel(%arg0: i32, %arg1: memref<128x32xf32, #tpu.memory_space<vmem>>, %arg2: memref<128x32xf32, #tpu.memory_space<vmem>>, %arg3: memref<32x32xbf16, #tpu.memory_space<vmem>>, %arg4: memref<32x32xbf16, #tpu.memory_space<vmem>>, %arg5: memref<32x32xbf16, #tpu.memory_space<vmem>>, %arg6: memref<32x32xbf16, #tpu.memory_space<vmem>>, %arg7: memref<32x1xf32, #tpu.memory_space<vmem>>, %arg8: memref<32x1xf32, #tpu.memory_space<vmem>>, %arg9: memref<32x1xf32, #tpu.memory_space<vmem>>, %arg10: memref<32x1xf32, #tpu.memory_space<vmem>>, %arg11: memref<1x1x128xf32, #tpu.memory_space<vmem>>) attributes {dimension_semantics = [#tpu.dimension_semantics<parallel>], iteration_bounds = array<i64: 1>, scalar_prefetch = 0 : i64, scratch_operands = 0 : i64, tpu.core_type = #tpu.core_type<tc>, window_params = [{transform_indices = @transform_0, window_bounds = array<i64: 128, 32>}, {transform_indices = @transform_1, window_bounds = array<i64: 128, 32>}, {pipeline_mode = #tpu.pipeline_mode<synchronous>, transform_indices = @transform_2, window_bounds = array<i64: 32, 32>}, {pipeline_mode = #tpu.pipeline_mode<synchronous>, transform_indices = @transform_3, window_bounds = array<i64: 32, 32>}, {pipeline_mode = #tpu.pipeline_mode<synchronous>, transform_indices = @transform_4, window_bounds = array<i64: 32, 32>}, {pipeline_mode = #tpu.pipeline_mode<synchronous>, transform_indices = @transform_5, window_bounds = array<i64: 32, 32>}, {pipeline_mode = #tpu.pipeline_mode<synchronous>, transform_indices = @transform_6, window_bounds = array<i64: 32, 1>}, {pipeline_mode = #tpu.pipeline_mode<synchronous>, transform_indices = @transform_7, window_bounds = array<i64: 32, 1>}, {pipeline_mode = #tpu.pipeline_mode<synchronous>, transform_indices = @transform_8, window_bounds = array<i64: 32, 1>}, {pipeline_mode = #tpu.pipeline_mode<synchronous>, transform_indices = @transform_9, window_bounds = array<i64: 32, 1>}, {transform_indices = @transform_10, window_bounds = array<i64: 1, 1, 128>}]} {
    %c0 = arith.constant 0 : index
    %c0_0 = arith.constant 0 : index
    %0 = vector.load %arg1[%c0, %c0_0] : memref<128x32xf32, #tpu.memory_space<vmem>>, vector<128x32xf32>
    %1 = arith.truncf %0 : vector<128x32xf32> to vector<128x32xbf16>
    %c0_1 = arith.constant 0 : index
    %c0_2 = arith.constant 0 : index
    %2 = vector.load %arg3[%c0_1, %c0_2] : memref<32x32xbf16, #tpu.memory_space<vmem>>, vector<32x32xbf16>
    %cst = arith.constant dense<0.000000e+00> : vector<32x128xf32>
    %3 = tpu.matmul %2, %1, %cst {dimension_numbers = #tpu.dot_dimension_numbers<[1], [1], [0], [0], [0, 0, 1, 0], [], []>} : vector<32x32xbf16>, vector<128x32xbf16>, vector<32x128xf32> -> vector<32x128xf32>
    %c0_3 = arith.constant 0 : index
    %c0_4 = arith.constant 0 : index
    %4 = vector.load %arg7[%c0_3, %c0_4] : memref<32x1xf32, #tpu.memory_space<vmem>>, vector<32x1xf32>
    %5 = vector.broadcast %4 : vector<32x1xf32> to vector<32x128xf32>
    %6 = arith.addf %3, %5 : vector<32x128xf32>
    %cst_5 = arith.constant 0.000000e+00 : f32
    %7 = vector.broadcast %cst_5 : f32 to vector<32x128xf32>
    %8 = arith.maximumf %6, %7 : vector<32x128xf32>
    %9 = arith.truncf %8 : vector<32x128xf32> to vector<32x128xbf16>
    %c0_6 = arith.constant 0 : index
    %c0_7 = arith.constant 0 : index
    %10 = vector.load %arg4[%c0_6, %c0_7] : memref<32x32xbf16, #tpu.memory_space<vmem>>, vector<32x32xbf16>
    %cst_8 = arith.constant dense<0.000000e+00> : vector<32x128xf32>
    %11 = tpu.matmul %10, %9, %cst_8 {dimension_numbers = #tpu.dot_dimension_numbers<[1], [0], [0], [1], [0, 0, 1, 1], [], []>} : vector<32x32xbf16>, vector<32x128xbf16>, vector<32x128xf32> -> vector<32x128xf32>
    %c0_9 = arith.constant 0 : index
    %c0_10 = arith.constant 0 : index
    %12 = vector.load %arg8[%c0_9, %c0_10] : memref<32x1xf32, #tpu.memory_space<vmem>>, vector<32x1xf32>
    %13 = vector.broadcast %12 : vector<32x1xf32> to vector<32x128xf32>
    %14 = arith.addf %11, %13 : vector<32x128xf32>
    %c0_11 = arith.constant 0 : index
    %c0_12 = arith.constant 0 : index
    %15 = vector.load %arg2[%c0_11, %c0_12] : memref<128x32xf32, #tpu.memory_space<vmem>>, vector<128x32xf32>
    %16 = arith.truncf %15 : vector<128x32xf32> to vector<128x32xbf16>
    %c0_13 = arith.constant 0 : index
    %c0_14 = arith.constant 0 : index
    %17 = vector.load %arg5[%c0_13, %c0_14] : memref<32x32xbf16, #tpu.memory_space<vmem>>, vector<32x32xbf16>
    %cst_15 = arith.constant dense<0.000000e+00> : vector<32x128xf32>
    %18 = tpu.matmul %17, %16, %cst_15 {dimension_numbers = #tpu.dot_dimension_numbers<[1], [1], [0], [0], [0, 0, 1, 0], [], []>} : vector<32x32xbf16>, vector<128x32xbf16>, vector<32x128xf32> -> vector<32x128xf32>
    %c0_16 = arith.constant 0 : index
    %c0_17 = arith.constant 0 : index
    %19 = vector.load %arg9[%c0_16, %c0_17] : memref<32x1xf32, #tpu.memory_space<vmem>>, vector<32x1xf32>
    %20 = vector.broadcast %19 : vector<32x1xf32> to vector<32x128xf32>
    %21 = arith.addf %18, %20 : vector<32x128xf32>
    %cst_18 = arith.constant 0.000000e+00 : f32
    %22 = vector.broadcast %cst_18 : f32 to vector<32x128xf32>
    %23 = arith.maximumf %21, %22 : vector<32x128xf32>
    %24 = arith.truncf %23 : vector<32x128xf32> to vector<32x128xbf16>
    %c0_19 = arith.constant 0 : index
    %c0_20 = arith.constant 0 : index
    %25 = vector.load %arg6[%c0_19, %c0_20] : memref<32x32xbf16, #tpu.memory_space<vmem>>, vector<32x32xbf16>
    %cst_21 = arith.constant dense<0.000000e+00> : vector<32x128xf32>
    %26 = tpu.matmul %25, %24, %cst_21 {dimension_numbers = #tpu.dot_dimension_numbers<[1], [0], [0], [1], [0, 0, 1, 1], [], []>} : vector<32x32xbf16>, vector<32x128xbf16>, vector<32x128xf32> -> vector<32x128xf32>
    %c0_22 = arith.constant 0 : index
    %c0_23 = arith.constant 0 : index
    %27 = vector.load %arg10[%c0_22, %c0_23] : memref<32x1xf32, #tpu.memory_space<vmem>>, vector<32x1xf32>
    %28 = vector.broadcast %27 : vector<32x1xf32> to vector<32x128xf32>
    %29 = arith.addf %26, %28 : vector<32x128xf32>
    %30 = arith.mulf %14, %29 : vector<32x128xf32>
    %cst_24 = arith.constant dense<0.000000e+00> : vector<128xf32>
    %31 = vector.multi_reduction <add>, %30, %cst_24 [0] : vector<32x128xf32> to vector<128xf32>
    %32 = vector.shape_cast %31 : vector<128xf32> to vector<1x128xf32>
    %c0_25 = arith.constant 0 : index
    %c0_26 = arith.constant 0 : index
    %c0_27 = arith.constant 0 : index
    %33 = vector.load %arg11[%c0_25, %c0_26, %c0_27] : memref<1x1x128xf32, #tpu.memory_space<vmem>>, vector<1x1x128xf32>
    %34 = vector.shape_cast %33 : vector<1x1x128xf32> to vector<1x128xf32>
    %35 = vector.shape_cast %32 : vector<1x128xf32> to vector<1x1x128xf32>
    tpu.vector_store %arg11[%c0_25, %c0_26, %c0_27], %35 {strides = array<i32>} : memref<1x1x128xf32, #tpu.memory_space<vmem>>, vector<1x1x128xf32>,
    return
  }
  func.func @transform_0(%arg0: i32) -> (i32, i32) {
    %c0_i32 = arith.constant 0 : i32
    %c0_i32_0 = arith.constant 0 : i32
    return %arg0, %c0_i32 : i32, i32
  }
  func.func @transform_1(%arg0: i32) -> (i32, i32) {
    %c0_i32 = arith.constant 0 : i32
    %c0_i32_0 = arith.constant 0 : i32
    return %arg0, %c0_i32 : i32, i32
  }
  func.func @transform_2(%arg0: i32) -> (i32, i32) {
    %c0_i32 = arith.constant 0 : i32
    %c0_i32_0 = arith.constant 0 : i32
    %c0_i32_1 = arith.constant 0 : i32
    return %c0_i32, %c0_i32_0 : i32, i32
  }
  func.func @transform_3(%arg0: i32) -> (i32, i32) {
    %c0_i32 = arith.constant 0 : i32
    %c0_i32_0 = arith.constant 0 : i32
    %c0_i32_1 = arith.constant 0 : i32
    return %c0_i32, %c0_i32_0 : i32, i32
  }
  func.func @transform_4(%arg0: i32) -> (i32, i32) {
    %c0_i32 = arith.constant 0 : i32
    %c0_i32_0 = arith.constant 0 : i32
    %c0_i32_1 = arith.constant 0 : i32
    return %c0_i32, %c0_i32_0 : i32, i32
  }
  func.func @transform_5(%arg0: i32) -> (i32, i32) {
    %c0_i32 = arith.constant 0 : i32
    %c0_i32_0 = arith.constant 0 : i32
    %c0_i32_1 = arith.constant 0 : i32
    return %c0_i32, %c0_i32_0 : i32, i32
  }
  func.func @transform_6(%arg0: i32) -> (i32, i32) {
    %c0_i32 = arith.constant 0 : i32
    %c0_i32_0 = arith.constant 0 : i32
    %c0_i32_1 = arith.constant 0 : i32
    return %c0_i32, %c0_i32_0 : i32, i32
  }
  func.func @transform_7(%arg0: i32) -> (i32, i32) {
    %c0_i32 = arith.constant 0 : i32
    %c0_i32_0 = arith.constant 0 : i32
    %c0_i32_1 = arith.constant 0 : i32
    return %c0_i32, %c0_i32_0 : i32, i32
  }
  func.func @transform_8(%arg0: i32) -> (i32, i32) {
    %c0_i32 = arith.constant 0 : i32
    %c0_i32_0 = arith.constant 0 : i32
    %c0_i32_1 = arith.constant 0 : i32
    return %c0_i32, %c0_i32_0 : i32, i32
  }
  func.func @transform_9(%arg0: i32) -> (i32, i32) {
    %c0_i32 = arith.constant 0 : i32
    %c0_i32_0 = arith.constant 0 : i32
    %c0_i32_1 = arith.constant 0 : i32
    return %c0_i32, %c0_i32_0 : i32, i32
  }
  func.func @transform_10(%arg0: i32) -> (i32, i32, i32) {
    %c0_i32 = arith.constant 0 : i32
    %c0_i32_0 = arith.constant 0 : i32
    %c0_i32_1 = arith.constant 0 : i32
    return %arg0, %c0_i32, %c0_i32_0 : i32, i32, i32
  }
}

module attributes {stable_mosaic.version = 11 : i64} {
  func.func @_dot_relu_kernel(%arg0: i32, %arg1: memref<128x32xf32, #tpu.memory_space<vmem>>, %arg2: memref<128x32xf32, #tpu.memory_space<vmem>>, %arg3: memref<32x32xbf16, #tpu.memory_space<vmem>>, %arg4: memref<32x32xbf16, #tpu.memory_space<vmem>>, %arg5: memref<32x32xbf16, #tpu.memory_space<vmem>>, %arg6: memref<32x32xbf16, #tpu.memory_space<vmem>>, %arg7: memref<32x1xf32, #tpu.memory_space<vmem>>, %arg8: memref<32x1xf32, #tpu.memory_space<vmem>>, %arg9: memref<32x1xf32, #tpu.memory_space<vmem>>, %arg10: memref<32x1xf32, #tpu.memory_space<vmem>>, %arg11: memref<1x1x128xf32, #tpu.memory_space<vmem>>) attributes {dimension_semantics = [#tpu.dimension_semantics<parallel>], iteration_bounds = array<i64: 1>, scalar_prefetch = 0 : i64, scratch_operands = 0 : i64, tpu.core_type = #tpu.core_type<tc>, window_params = [{transform_indices = @transform_0, window_bounds = array<i64: 128, 32>}, {transform_indices = @transform_1, window_bounds = array<i64: 128, 32>}, {pipeline_mode = #tpu.pipeline_mode<synchronous>, transform_indices = @transform_2, window_bounds = array<i64: 32, 32>}, {pipeline_mode = #tpu.pipeline_mode<synchronous>, transform_indices = @transform_3, window_bounds = array<i64: 32, 32>}, {pipeline_mode = #tpu.pipeline_mode<synchronous>, transform_indices = @transform_4, window_bounds = array<i64: 32, 32>}, {pipeline_mode = #tpu.pipeline_mode<synchronous>, transform_indices = @transform_5, window_bounds = array<i64: 32, 32>}, {pipeline_mode = #tpu.pipeline_mode<synchronous>, transform_indices = @transform_6, window_bounds = array<i64: 32, 1>}, {pipeline_mode = #tpu.pipeline_mode<synchronous>, transform_indices = @transform_7, window_bounds = array<i64: 32, 1>}, {pipeline_mode = #tpu.pipeline_mode<synchronous>, transform_indices = @transform_8, window_bounds = array<i64: 32, 1>}, {pipeline_mode = #tpu.pipeline_mode<synchronous>, transform_indices = @transform_9, window_bounds = array<i64: 32, 1>}, {transform_indices = @transform_10, window_bounds = array<i64: 1, 1, 128>}]} {
    %c0 = arith.constant 0 : index
    %c0_0 = arith.constant 0 : index
    %0 = vector.load %arg1[%c0, %c0_0] : memref<128x32xf32, #tpu.memory_space<vmem>>, vector<128x32xf32>
    %1 = arith.truncf %0 : vector<128x32xf32> to vector<128x32xbf16>
    %c0_1 = arith.constant 0 : index
    %c0_2 = arith.constant 0 : index
    %2 = vector.load %arg3[%c0_1, %c0_2] : memref<32x32xbf16, #tpu.memory_space<vmem>>, vector<32x32xbf16>
    %cst = arith.constant dense<0.000000e+00> : vector<32x128xf32>
    %3 = tpu.matmul %2, %1, %cst {dimension_numbers = #tpu.dot_dimension_numbers<[1], [1], [0], [0], [0, 0, 1, 0], [], []>} : vector<32x32xbf16>, vector<128x32xbf16>, vector<32x128xf32> -> vector<32x128xf32>
    %c0_3 = arith.constant 0 : index
    %c0_4 = arith.constant 0 : index
    %4 = vector.load %arg7[%c0_3, %c0_4] : memref<32x1xf32, #tpu.memory_space<vmem>>, vector<32x1xf32>
    %5 = vector.broadcast %4 : vector<32x1xf32> to vector<32x128xf32>
    %6 = arith.addf %3, %5 : vector<32x128xf32>
    %cst_5 = arith.constant 0.000000e+00 : f32
    %7 = vector.broadcast %cst_5 : f32 to vector<32x128xf32>
    %8 = arith.maximumf %6, %7 : vector<32x128xf32>
    %9 = arith.truncf %8 : vector<32x128xf32> to vector<32x128xbf16>
    %c0_6 = arith.constant 0 : index
    %c0_7 = arith.constant 0 : index
    %10 = vector.load %arg4[%c0_6, %c0_7] : memref<32x32xbf16, #tpu.memory_space<vmem>>, vector<32x32xbf16>
    %cst_8 = arith.constant dense<0.000000e+00> : vector<32x128xf32>
    %11 = tpu.matmul %10, %9, %cst_8 {dimension_numbers = #tpu.dot_dimension_numbers<[1], [0], [0], [1], [0, 0, 1, 1], [], []>} : vector<32x32xbf16>, vector<32x128xbf16>, vector<32x128xf32> -> vector<32x128xf32>
    %c0_9 = arith.constant 0 : index
    %c0_10 = arith.constant 0 : index
    %12 = vector.load %arg8[%c0_9, %c0_10] : memref<32x1xf32, #tpu.memory_space<vmem>>, vector<32x1xf32>
    %13 = vector.broadcast %12 : vector<32x1xf32> to vector<32x128xf32>
    %14 = arith.addf %11, %13 : vector<32x128xf32>
    %c0_11 = arith.constant 0 : index
    %c0_12 = arith.constant 0 : index
    %15 = vector.load %arg2[%c0_11, %c0_12] : memref<128x32xf32, #tpu.memory_space<vmem>>, vector<128x32xf32>
    %16 = arith.truncf %15 : vector<128x32xf32> to vector<128x32xbf16>
    %c0_13 = arith.constant 0 : index
    %c0_14 = arith.constant 0 : index
    %17 = vector.load %arg5[%c0_13, %c0_14] : memref<32x32xbf16, #tpu.memory_space<vmem>>, vector<32x32xbf16>
    %cst_15 = arith.constant dense<0.000000e+00> : vector<32x128xf32>
    %18 = tpu.matmul %17, %16, %cst_15 {dimension_numbers = #tpu.dot_dimension_numbers<[1], [1], [0], [0], [0, 0, 1, 0], [], []>} : vector<32x32xbf16>, vector<128x32xbf16>, vector<32x128xf32> -> vector<32x128xf32>
    %c0_16 = arith.constant 0 : index
    %c0_17 = arith.constant 0 : index
    %19 = vector.load %arg9[%c0_16, %c0_17] : memref<32x1xf32, #tpu.memory_space<vmem>>, vector<32x1xf32>
    %20 = vector.broadcast %19 : vector<32x1xf32> to vector<32x128xf32>
    %21 = arith.addf %18, %20 : vector<32x128xf32>
    %cst_18 = arith.constant 0.000000e+00 : f32
    %22 = vector.broadcast %cst_18 : f32 to vector<32x128xf32>
    %23 = arith.maximumf %21, %22 : vector<32x128xf32>
    %24 = arith.truncf %23 : vector<32x128xf32> to vector<32x128xbf16>
    %c0_19 = arith.constant 0 : index
    %c0_20 = arith.constant 0 : index
    %25 = vector.load %arg6[%c0_19, %c0_20] : memref<32x32xbf16, #tpu.memory_space<vmem>>, vector<32x32xbf16>
    %cst_21 = arith.constant dense<0.000000e+00> : vector<32x128xf32>
    %26 = tpu.matmul %25, %24, %cst_21 {dimension_numbers = #tpu.dot_dimension_numbers<[1], [0], [0], [1], [0, 0, 1, 1], [], []>} : vector<32x32xbf16>, vector<32x128xbf16>, vector<32x128xf32> -> vector<32x128xf32>
    %c0_22 = arith.constant 0 : index
    %c0_23 = arith.constant 0 : index
    %27 = vector.load %arg10[%c0_22, %c0_23] : memref<32x1xf32, #tpu.memory_space<vmem>>, vector<32x1xf32>
    %28 = vector.broadcast %27 : vector<32x1xf32> to vector<32x128xf32>
    %29 = arith.addf %26, %28 : vector<32x128xf32>
    %30 = arith.mulf %14, %29 : vector<32x128xf32>
    %cst_24 = arith.constant dense<0.000000e+00> : vector<128xf32>
    %31 = vector.multi_reduction <add>, %30, %cst_24 [0] : vector<32x128xf32> to vector<128xf32>
    %32 = vector.shape_cast %31 : vector<128xf32> to vector<1x128xf32>
    %c0_25 = arith.constant 0 : index
    %c0_26 = arith.constant 0 : index
    %c0_27 = arith.constant 0 : index
    %33 = vector.load %arg11[%c0_25, %c0_26, %c0_27] : memref<1x1x128xf32, #tpu.memory_space<vmem>>, vector<1x1x128xf32>
    %34 = vector.shape_cast %33 : vector<1x1x128xf32> to vector<1x128xf32>
    %35 = vector.shape_cast %32 : vector<1x128xf32> to vector<1x1x128xf32>
    tpu.vector_store %arg11[%c0_25, %c0_26, %c0_27], %35 {strides = array<i32>} : memref<1x1x128xf32, #tpu.memory_space<vmem>>, vector<1x1x128xf32>,
    return
  }
  func.func @transform_0(%arg0: i32) -> (i32, i32) {
    %c0_i32 = arith.constant 0 : i32
    %c0_i32_0 = arith.constant 0 : i32
    return %arg0, %c0_i32 : i32, i32
  }
  func.func @transform_1(%arg0: i32) -> (i32, i32) {
    %c0_i32 = arith.constant 0 : i32
    %c0_i32_0 = arith.constant 0 : i32
    return %arg0, %c0_i32 : i32, i32
  }
  func.func @transform_2(%arg0: i32) -> (i32, i32) {
    %c0_i32 = arith.constant 0 : i32
    %c0_i32_0 = arith.constant 0 : i32
    %c0_i32_1 = arith.constant 0 : i32
    return %c0_i32, %c0_i32_0 : i32, i32
  }
  func.func @transform_3(%arg0: i32) -> (i32, i32) {
    %c0_i32 = arith.constant 0 : i32
    %c0_i32_0 = arith.constant 0 : i32
    %c0_i32_1 = arith.constant 0 : i32
    return %c0_i32, %c0_i32_0 : i32, i32
  }
  func.func @transform_4(%arg0: i32) -> (i32, i32) {
    %c0_i32 = arith.constant 0 : i32
    %c0_i32_0 = arith.constant 0 : i32
    %c0_i32_1 = arith.constant 0 : i32
    return %c0_i32, %c0_i32_0 : i32, i32
  }
  func.func @transform_5(%arg0: i32) -> (i32, i32) {
    %c0_i32 = arith.constant 0 : i32
    %c0_i32_0 = arith.constant 0 : i32
    %c0_i32_1 = arith.constant 0 : i32
    return %c0_i32, %c0_i32_0 : i32, i32
  }
  func.func @transform_6(%arg0: i32) -> (i32, i32) {
    %c0_i32 = arith.constant 0 : i32
    %c0_i32_0 = arith.constant 0 : i32
    %c0_i32_1 = arith.constant 0 : i32
    return %c0_i32, %c0_i32_0 : i32, i32
  }
  func.func @transform_7(%arg0: i32) -> (i32, i32) {
    %c0_i32 = arith.constant 0 : i32
    %c0_i32_0 = arith.constant 0 : i32
    %c0_i32_1 = arith.constant 0 : i32
    return %c0_i32, %c0_i32_0 : i32, i32
  }
  func.func @transform_8(%arg0: i32) -> (i32, i32) {
    %c0_i32 = arith.constant 0 : i32
    %c0_i32_0 = arith.constant 0 : i32
    %c0_i32_1 = arith.constant 0 : i32
    return %c0_i32, %c0_i32_0 : i32, i32
  }
  func.func @transform_9(%arg0: i32) -> (i32, i32) {
    %c0_i32 = arith.constant 0 : i32
    %c0_i32_0 = arith.constant 0 : i32
    %c0_i32_1 = arith.constant 0 : i32
    return %c0_i32, %c0_i32_0 : i32, i32
  }
  func.func @transform_10(%arg0: i32) -> (i32, i32, i32) {
    %c0_i32 = arith.constant 0 : i32
    %c0_i32_0 = arith.constant 0 : i32
    %c0_i32_1 = arith.constant 0 : i32
    return %arg0, %c0_i32, %c0_i32_0 : i32, i32, i32
  }
}

</mosaic_0001>

<bundles_post_ra>
// kernel: tpu_custom_call.1
= control target key start
LH: loop header
LB: loop body
LE: loop exit
PB: predicated region body
PF: predicated region fallthrough
CT: control target
= control target key end

     0   :  { %vm99_vm0 = vcmask 261120   ;;  %v696_v5 = vmov 0   ;;  %s964_s0 = inlined_call_operand.vmem [shape: f32[128,32], index: 0, kind: input, shape index: {}]   ;;  %s965_s1 = inlined_call_operand.vmem [shape: f32[128,32], index: 1, kind: input, shape index: {}]   ;;  %s966_s2 = inlined_call_operand.vmem [shape: bf16[32,32], index: 2, kind: input, shape index: {}]   ;;  %s967_s3 = inlined_call_operand.vmem [shape: bf16[32,32], index: 3, kind: input, shape index: {}]   ;;  %s968_s4 = inlined_call_operand.vmem [shape: bf16[32,32], index: 4, kind: input, shape index: {}]   ;;  %s969_s5 = inlined_call_operand.vmem [shape: bf16[32,32], index: 5, kind: input, shape index: {}]   ;;  %s970_s6 = inlined_call_operand.vmem [shape: f32[32,1], index: 6, kind: input, shape index: {}]   ;;  %s971_s7 = inlined_call_operand.vmem [shape: f32[32,1], index: 7, kind: input, shape index: {}]   ;;  %s972_s8 = inlined_call_operand.vmem [shape: f32[32,1], index: 8, kind: input, shape index: {}]   ;;  %s973_s9 = inlined_call_operand.vmem [shape: f32[32,1], index: 9, kind: input, shape index: {}]   ;;  %s974_s10 = inlined_call_operand.hbm [shape: f32[1,1,128], index: 10, kind: output, shape index: {}]  }
   0x1   :  { %v51_v0 = vld [vmem:[%s964_s0 + $0x70] sm:$0xff]  ;;  %v52_v1 = vld [vmem:[%s964_s0 + $0x78] sm:$0xff]  ;;  %v49_v2 = vld [vmem:[%s964_s0 + $0x60] sm:$0xff]  ;;  %664 = vset.pattern.permute.xlu0 %v696_v5  ;;  %665 = vset.pattern.permute.xlu1 %v696_v5 }
   0x2   :  { %v60_v3 = vpack.c.bf16 %v52_v1, %v51_v0  ;;  %v50_v4 = vld [vmem:[%s964_s0 + $0x68] sm:$0xff]  ;;  %v47_v8 = vld [vmem:[%s964_s0 + $0x50] sm:$0xff]  ;;  %v48_v9 = vld [vmem:[%s964_s0 + $0x58] sm:$0xff] }
   0x3   :  { %v59_v6 = vpack.c.bf16 %v50_v4, %v49_v2  ;;  %v666_v10 = vld [vmem:[%s966_s2] sm:$0xff]   ;;  %v67_v11 = vld [vmem:[%s970_s6 + $0x10] sm:$0xff]  ;;  %v58_v14 = vpack.c.bf16 %v48_v9, %v47_v8  ;;  %v68_v15 = vld [vmem:[%s970_s6 + $0x18] sm:$0xff] }
   0x4   :  { %646 = vmatprep.subr.msk.bf16.mxu0 %vm99_vm0, %v60_v3  ;;  %v128_v7 = vsel %vm99_vm0, %v60_v3, 0  ;;  %606 = vmatprep.mubr.msk.bf16.mxu0 %vm99_vm0, %v666_v10  ;;  %v65_v12 = vld [vmem:[%s970_s6] sm:$0xff]  ;;  %v66_v16 = vld [vmem:[%s970_s6 + $0x8] sm:$0xff]  ;;  %v308_v19 = vld [vmem:[%s972_s8 + $0x10] sm:$0xff] }
   0x5   :  { %591 = vmatpush3.bf16.xpose.msra.mxu0 %v128_v7  ;;  %81 = vperm.xlu0 %664, %v67_v11   ;;  %v125_v13 = vsel %vm99_vm0, %v59_v6, 0  ;;  %v45_v17 = vld [vmem:[%s964_s0 + $0x40] sm:$0xff]  ;;  %v46_v18 = vld [vmem:[%s964_s0 + $0x48] sm:$0xff]  ;;  %v309_v20 = vld [vmem:[%s972_s8 + $0x18] sm:$0xff] }
   0x6   :  { %647 = vmatprep.subr.msk.bf16.mxu0 %vm99_vm0, %v59_v6  ;;  %71 = vperm.xlu1 %665, %v65_v12  }
   0x9   :  { %86 = vperm.xlu0 %664, %v68_v15  }
   0xa   :  { %76 = vperm.xlu1 %665, %v66_v16  }
   0xd   :  { %593 = vmatpush3.bf16.xpose.msra.mxu0 %v125_v13  ;;  %322 = vperm.xlu0 %664, %v308_v19  }
   0xe   :  { %648 = vmatprep.subr.msk.bf16.mxu0 %vm99_vm0, %v58_v14 }
   0xf   :  { %15 = vsyncpa [#allocation3], 0  ;;  %v122_v21 = vsel %vm99_vm0, %v58_v14, 0  ;;  %v57_v22 = vpack.c.bf16 %v46_v18, %v45_v17  ;;  %v306_v23 = vld [vmem:[%s972_s8] sm:$0xff]  ;;  %327 = vperm.xlu1 %665, %v309_v20   ;;  %v307_v24 = vld [vmem:[%s972_s8 + $0x8] sm:$0xff] }
  0x10   :  { %v189_v25 = vld [vmem:[%s971_s7] sm:$0xff]  ;;  %v43_v26 = vld [vmem:[%s964_s0 + $0x30] sm:$0xff]  ;;  %v44_v27 = vld [vmem:[%s964_s0 + $0x38] sm:$0xff] }
  0x11   :  { %312 = vperm.xlu0 %664, %v306_v23   ;;  %v190_v28 = vld [vmem:[%s971_s7 + $0x8] sm:$0xff]  ;;  %v119_v29 = vsel %vm99_vm0, %v57_v22, 0  ;;  %v56_v30 = vpack.c.bf16 %v44_v27, %v43_v26  ;;  %v429_v31 = vld [vmem:[%s973_s9] sm:$0xff]  ;;  %v191_v33 = vld [vmem:[%s971_s7 + $0x10] sm:$0xff] }
  0x12   :  { %v430_v32 = vld [vmem:[%s973_s9 + $0x8] sm:$0xff]  ;;  %v41_v34 = vld [vmem:[%s964_s0 + $0x20] sm:$0xff]  ;;  %v431_v36 = vld [vmem:[%s973_s9 + $0x10] sm:$0xff] }
  0x13   :  { %317 = vperm.xlu1 %665, %v307_v24   ;;  %v42_v35 = vld [vmem:[%s964_s0 + $0x28] sm:$0xff]  ;;  %v116_v37 = vsel %vm99_vm0, %v56_v30, 0  ;;  %v192_v39 = vld [vmem:[%s971_s7 + $0x18] sm:$0xff]  ;;  %v39_v41 = vld [vmem:[%s964_s0 + $0x10] sm:$0xff] }
  0x14   :  { %v55_v38 = vpack.c.bf16 %v42_v35, %v41_v34  ;;  %v432_v40 = vld [vmem:[%s973_s9 + $0x18] sm:$0xff]  ;;  %v37_v45 = vld [vmem:[%s964_s0] sm:$0xff]  ;;  %v38_v46 = vld [vmem:[%s964_s0 + $0x8] sm:$0xff] }
  0x15   :  { %595 = vmatpush3.bf16.xpose.msra.mxu0 %v122_v21  ;;  %195 = vperm.xlu0 %664, %v189_v25   ;;  %v40_v42 = vld [vmem:[%s964_s0 + $0x18] sm:$0xff]  ;;  %v53_v48 = vpack.c.bf16 %v38_v46, %v37_v45  ;;  %v667_v50 = vld [vmem:[%s966_s2 + $0x8] sm:$0xff]   ;;  %v668_v51 = vld [vmem:[%s967_s3] sm:$0xff]  }
  0x16   :  { %649 = vmatprep.subr.msk.bf16.mxu0 %vm99_vm0, %v57_v22  ;;  %v113_v43 = vsel %vm99_vm0, %v55_v38, 0  ;;  %v54_v44 = vpack.c.bf16 %v40_v42, %v39_v41  ;;  %614 = vmatprep.mubr.msk.bf16.mxu1 %vm99_vm0, %v668_v51  ;;  %v292_v5 = vld [vmem:[%s965_s1 + $0x70] sm:$0xff]  ;;  %v293_v6 = vld [vmem:[%s965_s1 + $0x78] sm:$0xff]  ;;  %v290_v9 = vld [vmem:[%s965_s1 + $0x60] sm:$0xff] }
  0x17   :  { %200 = vperm.xlu1 %665, %v190_v28   ;;  %v107_v49 = vsel %vm99_vm0, %v53_v48, 0  ;;  %v301_v8 = vpack.c.bf16 %v293_v6, %v292_v5  ;;  %v291_v10 = vld [vmem:[%s965_s1 + $0x68] sm:$0xff]  ;;  %v670_v12 = vld [vmem:[%s968_s4] sm:$0xff]   ;;  %v288_v15 = vld [vmem:[%s965_s1 + $0x50] sm:$0xff] }
  0x18   :  { %v110_v47 = vsel %vm99_vm0, %v54_v44, 0  ;;  %v669_v11 = vld [vmem:[%s967_s3 + $0x8] sm:$0xff]   ;;  %v300_v14 = vpack.c.bf16 %v291_v10, %v290_v9  ;;  %v289_v16 = vld [vmem:[%s965_s1 + $0x58] sm:$0xff]  ;;  %v286_v19 = vld [vmem:[%s965_s1 + $0x40] sm:$0xff] }
  0x19   :  { %435 = vperm.xlu0 %664, %v429_v31   ;;  %v368_v13 = vsel %vm99_vm0, %v301_v8, 0  ;;  %v299_v18 = vpack.c.bf16 %v289_v16, %v288_v15  ;;  %v287_v20 = vld [vmem:[%s965_s1 + $0x48] sm:$0xff]  ;;  %v284_v23 = vld [vmem:[%s965_s1 + $0x30] sm:$0xff]  ;;  %v285_v24 = vld [vmem:[%s965_s1 + $0x38] sm:$0xff] }
  0x1a   :  { %v365_v17 = vsel %vm99_vm0, %v300_v14, 0  ;;  %v298_v22 = vpack.c.bf16 %v287_v20, %v286_v19  ;;  %v297_v26 = vpack.c.bf16 %v285_v24, %v284_v23  ;;  %v282_v27 = vld [vmem:[%s965_s1 + $0x20] sm:$0xff]  ;;  %v283_v28 = vld [vmem:[%s965_s1 + $0x28] sm:$0xff]  ;;  %v280_v31 = vld [vmem:[%s965_s1 + $0x10] sm:$0xff] }
  0x1b   :  { %440 = vperm.xlu1 %665, %v430_v32   ;;  %v362_v21 = vsel %vm99_vm0, %v299_v18, 0  ;;  %v281_v32 = vld [vmem:[%s965_s1 + $0x18] sm:$0xff]  ;;  %v278_v35 = vld [vmem:[%s965_s1] sm:$0xff] }
  0x1c   :  { %v359_v25 = vsel %vm99_vm0, %v298_v22, 0  ;;  %v295_v34 = vpack.c.bf16 %v281_v32, %v280_v31  ;;  %v672_v41 = vld [vmem:[%s969_s5] sm:$0xff]  }
  0x1d   :  { %597 = vmatpush3.bf16.xpose.msra.mxu0 %v119_v29  ;;  %205 = vperm.xlu0 %664, %v191_v33   ;;  %v356_v29 = vsel %vm99_vm0, %v297_v26, 0 }
  0x1e   :  { %650 = vmatprep.subr.msk.bf16.mxu0 %vm99_vm0, %v56_v30  ;;  %v296_v30 = vpack.c.bf16 %v283_v28, %v282_v27 }
  0x1f   :  { %445 = vperm.xlu1 %665, %v431_v36   ;;  %v279_v36 = vld [vmem:[%s965_s1 + $0x8] sm:$0xff] }
  0x20   :  { %v353_v33 = vsel %vm99_vm0, %v296_v30, 0 }
  0x21   :  { %210 = vperm.xlu0 %664, %v192_v39  }
  0x23   :  { %450 = vperm.xlu1 %665, %v432_v40   ;;  %v671_v40 = vld [vmem:[%s968_s4 + $0x8] sm:$0xff]  }
  0x25   :  { %599 = vmatpush3.bf16.xpose.msra.mxu0 %v116_v37  ;;  %v350_v37 = vsel %vm99_vm0, %v295_v34, 0 }
  0x26   :  { %651 = vmatprep.subr.msk.bf16.mxu0 %vm99_vm0, %v55_v38  ;;  %v294_v38 = vpack.c.bf16 %v279_v36, %v278_v35 }
  0x28   :  { %v347_v39 = vsel %vm99_vm0, %v294_v38, 0 }
  0x2d   :  { %601 = vmatpush3.bf16.xpose.msra.mxu0 %v113_v43 }
  0x2e   :  { %652 = vmatprep.subr.msk.bf16.mxu0 %vm99_vm0, %v54_v44 }
  0x35   :  { %603 = vmatpush3.bf16.xpose.msra.mxu0 %v110_v47 }
  0x36   :  { %653 = vmatprep.subr.msk.bf16.mxu0 %vm99_vm0, %v53_v48 }
  0x3d   :  { %605 = vmatpush3.bf16.xpose.msra.mxu0 %v107_v49 }
  0x44   :  { %607 = vmatmul.mubr.msk.bf16.vlgmr.msra.gmra.mxu0 %vm99_vm0, %v667_v50 }
  0x45   :  { %642 = vmatprep.mubr.msk.bf16.mxu0 %vm99_vm0, %v672_v41 }
  0x80   :  { %v82_v52 = vpop.permute.xlu0 %81 }
  0x81   :  { %v72_v53 = vpop.permute.xlu1 %71 }
  0x84   :  { %v87_v57 = vpop.permute.xlu0 %86 }
  0x85   :  { %v77_v61 = vpop.permute.xlu1 %76 }
  0x88   :  { %v323_v45 = vpop.permute.xlu0 %322 }
  0x8a   :  { %v328_v47 = vpop.permute.xlu1 %327 }
  0x8c   :  { %v313_v51 = vpop.permute.xlu0 %312 }
 0x104   :  { %v608_v54 = vpop.f32.mrf.mxu0 }
 0x105   :  { %v173_v56 = vadd.f32 %v608_v54, %v82_v52 }
 0x106   :  { %v164_v55 = vpop.f32.mrf.mxu0 }
 0x107   :  { %v165_v59 = vadd.f32 %v164_v55, %v72_v53  ;;  %v181_v63 = vmax.f32 %v173_v56, 0.0  ;;  %v318_v55 = vpop.permute.xlu1 %317 }
 0x108   :  { %v609_v58 = vpop.f32.mrf.mxu0 }
 0x109   :  { %v176_v60 = vadd.f32 %v609_v58, %v87_v57  ;;  %v179_v2 = vmax.f32 %v165_v59, 0.0 }
 0x10a   :  { %v167_v62 = vpop.f32.mrf.mxu0 }
 0x10b   :  { %v182_v0 = vmax.f32 %v176_v60, 0.0  ;;  %v168_v1 = vadd.f32 %v167_v62, %v77_v61 }
 0x10d   :  { %v180_v3 = vmax.f32 %v168_v1, 0.0  ;;  %v184_v4 = vpack.c.bf16 %v182_v0, %v181_v63  ;;  %v673_v0 = vld [vmem:[%s969_s5 + $0x8] sm:$0xff]   ;;  %v201_v1 = vpop.permute.xlu1 %200  ;;  %s697_s5 = smov [#allocation2]  }
 0x10e   :  { %s538_s27 = sshll.u32 %s697_s5, 4  ;;  %s539_s27 = int_to_ptr.vmem [resolvable:$true] %s538_s27 }
 0x10f   :  { %v183_v7 = vpack.c.bf16 %v180_v3, %v179_v2  ;;  %610 = vmatprep.subr.bf16.mxu1 %v184_v4  ;;  %v196_v2 = vpop.permute.xlu0 %195  ;;  %s674_s3 = scalar_lea.vmem %s539_s27, 16  ;;  %s678_s28 = scalar_lea.vmem %s539_s27, 32 }
 0x110   :  { %611 = vmatpush3.bf16.msra.mxu1 %v184_v4  ;;  %p675_p0 = scmp.ne.s32.totalorder %s539_s27, %s674_s3  ;;  %p679_p1 = scmp.lt.s32.totalorder %s539_s27, %s539_s27 }
 0x111   :  { %612 = vmatprep.subr.bf16.mxu1 %v183_v7  ;;  %v441_v3 = vpop.permute.xlu1 %440  ;;  %p680_p2 = scmp.lt.s32.totalorder %s678_s28, %s674_s3 }
 0x113   :  { %v436_v4 = vpop.permute.xlu0 %435  ;;  %p681_p3 = por %p680_p2, %p679_p1 }
 0x114   :  { %613 = vmatpush3.bf16.msra.mxu1 %v183_v7 }
 0x115   :  { %654 = vmatprep.subr.msk.bf16.mxu1 %vm99_vm0, %v301_v8  ;;  %v446_v6 = vpop.permute.xlu1 %445  ;;  %p682_p4 = pnand %p681_p3, %p675_p0 }
 0x117   :  { %615 = vmatmul.mubr.msk.bf16.vlgmr.msra.gmra.mxu1 %vm99_vm0, %v669_v11  ;;  %v206_v8 = vpop.permute.xlu0 %205 }
 0x118   :  { %619 = vmatpush3.bf16.xpose.msra.mxu1 %v368_v13  ;;  %634 = vmatprep.mubr.msk.bf16.mxu1 %vm99_vm0, %v670_v12 }
 0x119   :  { %655 = vmatprep.subr.msk.bf16.mxu1 %vm99_vm0, %v300_v14  ;;  %v451_v16 = vpop.permute.xlu1 %450 }
 0x120   :  { %621 = vmatpush3.bf16.xpose.msra.mxu1 %v365_v17 }
 0x121   :  { %656 = vmatprep.subr.msk.bf16.mxu1 %vm99_vm0, %v299_v18 }
 0x128   :  { %623 = vmatpush3.bf16.xpose.msra.mxu1 %v362_v21  ;;  %v211_v21 = vpop.permute.xlu0 %210 }
 0x129   :  { %657 = vmatprep.subr.msk.bf16.mxu1 %vm99_vm0, %v298_v22 }
 0x130   :  { %625 = vmatpush3.bf16.xpose.msra.mxu1 %v359_v25 }
 0x131   :  { %658 = vmatprep.subr.msk.bf16.mxu1 %vm99_vm0, %v297_v26 }
 0x138   :  { %627 = vmatpush3.bf16.xpose.msra.mxu1 %v356_v29 }
 0x139   :  { %659 = vmatprep.subr.msk.bf16.mxu1 %vm99_vm0, %v296_v30 }
 0x140   :  { %629 = vmatpush3.bf16.xpose.msra.mxu1 %v353_v33 }
 0x141   :  { %660 = vmatprep.subr.msk.bf16.mxu1 %vm99_vm0, %v295_v34 }
 0x148   :  { %631 = vmatpush3.bf16.xpose.msra.mxu1 %v350_v37 }
 0x149   :  { %661 = vmatprep.subr.msk.bf16.mxu1 %vm99_vm0, %v294_v38 }
 0x150   :  { %633 = vmatpush3.bf16.xpose.msra.mxu1 %v347_v39 }
 0x157   :  { %635 = vmatmul.mubr.msk.bf16.vlgmr.msra.gmra.mxu1 %vm99_vm0, %v671_v40 }
 0x1d7   :  { %v616_v42 = vpop.f32.mrf.mxu1 }
 0x1d8   :  { %v272_v17 = vadd.f32 %v616_v42, %v206_v8 }
 0x1d9   :  { %v263_v43 = vpop.f32.mrf.mxu1 }
 0x1da   :  { %v264_v12 = vadd.f32 %v263_v43, %v196_v2 }
 0x1db   :  { %v617_v44 = vpop.f32.mrf.mxu1 }
 0x1dc   :  { %v275_v22 = vadd.f32 %v617_v44, %v211_v21 }
 0x1dd   :  { %v266_v46 = vpop.f32.mrf.mxu1 }
 0x1de   :  { %v267_v13 = vadd.f32 %v266_v46, %v201_v1 }
 0x217   :  { %v636_v48 = vpop.f32.mrf.mxu1 }
 0x218   :  { %v413_v50 = vadd.f32 %v636_v48, %v323_v45 }
 0x219   :  { %v404_v49 = vpop.f32.mrf.mxu1 }
 0x21a   :  { %v405_v53 = vadd.f32 %v404_v49, %v313_v51  ;;  %v421_v57 = vmax.f32 %v413_v50, 0.0 }
 0x21b   :  { %v637_v52 = vpop.f32.mrf.mxu1 }
 0x21c   :  { %v416_v54 = vadd.f32 %v637_v52, %v328_v47  ;;  %v419_v60 = vmax.f32 %v405_v53, 0.0 }
 0x21d   :  { %v407_v56 = vpop.f32.mrf.mxu1 }
 0x21e   :  { %v422_v58 = vmax.f32 %v416_v54, 0.0  ;;  %v408_v59 = vadd.f32 %v407_v56, %v318_v55 }
 0x220   :  { %v424_v61 = vpack.c.bf16 %v422_v58, %v421_v57  ;;  %v420_v62 = vmax.f32 %v408_v59, 0.0 }
 0x222   :  { %v423_v63 = vpack.c.bf16 %v420_v62, %v419_v60  ;;  %638 = vmatprep.subr.bf16.mxu0 %v424_v61 }
 0x223   :  { %639 = vmatpush3.bf16.msra.mxu0 %v424_v61 }
 0x224   :  { %640 = vmatprep.subr.bf16.mxu0 %v423_v63 }
 0x227   :  { %641 = vmatpush3.bf16.msra.mxu0 %v423_v63 }
 0x22a   :  { %643 = vmatmul.mubr.msk.bf16.vlgmr.msra.gmra.mxu0 %vm99_vm0, %v673_v0 }
 0x2ea   :  { %v644_v5 = vpop.f32.mrf.mxu0 }
 0x2eb   :  { %v512_v14 = vadd.f32 %v644_v5, %v446_v6 }
 0x2ec   :  { %v503_v7 = vpop.f32.mrf.mxu0 }
 0x2ed   :  { %v504_v10 = vadd.f32 %v503_v7, %v436_v4  ;;  %v520_v23 = vmul.f32 %v512_v14, %v272_v17 }
 0x2ee   :  { %v645_v9 = vpop.f32.mrf.mxu0 }
 0x2ef   :  { %v518_v18 = vmul.f32 %v504_v10, %v264_v12  ;;  %v515_v19 = vadd.f32 %v645_v9, %v451_v16 }
 0x2f0   :  { %v506_v11 = vpop.f32.mrf.mxu0 }
 0x2f1   :  { %v507_v15 = vadd.f32 %v506_v11, %v441_v3  ;;  %v521_v25 = vmul.f32 %v515_v19, %v275_v22 }
 0x2f3   :  { %v519_v20 = vmul.f32 %v507_v15, %v267_v13 }
 0x2f5   :  { %v522_v24 = vadd.f32 %v519_v20, %v518_v18 }
 0x2f7   :  { %v523_v26 = vadd.f32 %v522_v24, %v520_v23 }
 0x2f9   :  { %v524_v27 = vadd.f32 %v523_v26, %v521_v25 }
 0x2fb   :  { %v525_v28 = vrot.slane %v524_v27, 4 }
 0x2fd   :  { %v526_v29 = vadd.f32 %v525_v28, %v524_v27 }
 0x2ff   :  { %v527_v30 = vrot.slane %v526_v29, 2 }
 0x301   :  { %v528_v31 = vadd.f32 %v527_v30, %v526_v29 }
 0x303   :  { %v529_v32 = vrot.slane %v528_v31, 1 }
 0x305   :  { %v530_v33 = vadd.f32 %v529_v32, %v528_v31 }
 0x307   :  { %531 = vst [vmem:[#allocation2] sm:$0x1] %v530_v33 }
 0x308   :  { %685 = shalt.err (!%p682_p4)
}
 0x309   :  { %541 = dma.vmem_to_hbm [thread:$0]  %s539_s27, 16, %s974_s10, [#allocation3]  }
 0x30a   :  { %694 = dma.done.wait [#allocation3], 16  }
 0x30b   :  { %695 = vsyncadd [#allocation3], 4294967280 }
 0x30c   :  { %545 = vsyncpa [#allocation3], 1 }

// kernel: tpu_custom_call.1
= control target key start
LH: loop header
LB: loop body
LE: loop exit
PB: predicated region body
PF: predicated region fallthrough
CT: control target
= control target key end

     0   :  { %vm99_vm0 = vcmask 261120   ;;  %v696_v5 = vmov 0   ;;  %s964_s0 = inlined_call_operand.vmem [shape: f32[128,32], index: 0, kind: input, shape index: {}]   ;;  %s965_s1 = inlined_call_operand.vmem [shape: f32[128,32], index: 1, kind: input, shape index: {}]   ;;  %s966_s2 = inlined_call_operand.vmem [shape: bf16[32,32], index: 2, kind: input, shape index: {}]   ;;  %s967_s3 = inlined_call_operand.vmem [shape: bf16[32,32], index: 3, kind: input, shape index: {}]   ;;  %s968_s4 = inlined_call_operand.vmem [shape: bf16[32,32], index: 4, kind: input, shape index: {}]   ;;  %s969_s5 = inlined_call_operand.vmem [shape: bf16[32,32], index: 5, kind: input, shape index: {}]   ;;  %s970_s6 = inlined_call_operand.vmem [shape: f32[32,1], index: 6, kind: input, shape index: {}]   ;;  %s971_s7 = inlined_call_operand.vmem [shape: f32[32,1], index: 7, kind: input, shape index: {}]   ;;  %s972_s8 = inlined_call_operand.vmem [shape: f32[32,1], index: 8, kind: input, shape index: {}]   ;;  %s973_s9 = inlined_call_operand.vmem [shape: f32[32,1], index: 9, kind: input, shape index: {}]   ;;  %s974_s10 = inlined_call_operand.hbm [shape: f32[1,1,128], index: 10, kind: output, shape index: {}]  }
   0x1   :  { %v51_v0 = vld [vmem:[%s964_s0 + $0x70] sm:$0xff]  ;;  %v52_v1 = vld [vmem:[%s964_s0 + $0x78] sm:$0xff]  ;;  %v49_v2 = vld [vmem:[%s964_s0 + $0x60] sm:$0xff]  ;;  %664 = vset.pattern.permute.xlu0 %v696_v5  ;;  %665 = vset.pattern.permute.xlu1 %v696_v5 }
   0x2   :  { %v60_v3 = vpack.c.bf16 %v52_v1, %v51_v0  ;;  %v50_v4 = vld [vmem:[%s964_s0 + $0x68] sm:$0xff]  ;;  %v47_v8 = vld [vmem:[%s964_s0 + $0x50] sm:$0xff]  ;;  %v48_v9 = vld [vmem:[%s964_s0 + $0x58] sm:$0xff] }
   0x3   :  { %v59_v6 = vpack.c.bf16 %v50_v4, %v49_v2  ;;  %v666_v10 = vld [vmem:[%s966_s2] sm:$0xff]   ;;  %v67_v11 = vld [vmem:[%s970_s6 + $0x10] sm:$0xff]  ;;  %v58_v14 = vpack.c.bf16 %v48_v9, %v47_v8  ;;  %v68_v15 = vld [vmem:[%s970_s6 + $0x18] sm:$0xff] }
   0x4   :  { %646 = vmatprep.subr.msk.bf16.mxu0 %vm99_vm0, %v60_v3  ;;  %v128_v7 = vsel %vm99_vm0, %v60_v3, 0  ;;  %606 = vmatprep.mubr.msk.bf16.mxu0 %vm99_vm0, %v666_v10  ;;  %v65_v12 = vld [vmem:[%s970_s6] sm:$0xff]  ;;  %v66_v16 = vld [vmem:[%s970_s6 + $0x8] sm:$0xff]  ;;  %v308_v19 = vld [vmem:[%s972_s8 + $0x10] sm:$0xff] }
   0x5   :  { %591 = vmatpush3.bf16.xpose.msra.mxu0 %v128_v7  ;;  %81 = vperm.xlu0 %664, %v67_v11   ;;  %v125_v13 = vsel %vm99_vm0, %v59_v6, 0  ;;  %v45_v17 = vld [vmem:[%s964_s0 + $0x40] sm:$0xff]  ;;  %v46_v18 = vld [vmem:[%s964_s0 + $0x48] sm:$0xff]  ;;  %v309_v20 = vld [vmem:[%s972_s8 + $0x18] sm:$0xff] }
   0x6   :  { %647 = vmatprep.subr.msk.bf16.mxu0 %vm99_vm0, %v59_v6  ;;  %71 = vperm.xlu1 %665, %v65_v12  }
   0x9   :  { %86 = vperm.xlu0 %664, %v68_v15  }
   0xa   :  { %76 = vperm.xlu1 %665, %v66_v16  }
   0xd   :  { %593 = vmatpush3.bf16.xpose.msra.mxu0 %v125_v13  ;;  %322 = vperm.xlu0 %664, %v308_v19  }
   0xe   :  { %648 = vmatprep.subr.msk.bf16.mxu0 %vm99_vm0, %v58_v14 }
   0xf   :  { %15 = vsyncpa [#allocation3], 0  ;;  %v122_v21 = vsel %vm99_vm0, %v58_v14, 0  ;;  %v57_v22 = vpack.c.bf16 %v46_v18, %v45_v17  ;;  %v306_v23 = vld [vmem:[%s972_s8] sm:$0xff]  ;;  %327 = vperm.xlu1 %665, %v309_v20   ;;  %v307_v24 = vld [vmem:[%s972_s8 + $0x8] sm:$0xff] }
  0x10   :  { %v189_v25 = vld [vmem:[%s971_s7] sm:$0xff]  ;;  %v43_v26 = vld [vmem:[%s964_s0 + $0x30] sm:$0xff]  ;;  %v44_v27 = vld [vmem:[%s964_s0 + $0x38] sm:$0xff] }
  0x11   :  { %312 = vperm.xlu0 %664, %v306_v23   ;;  %v190_v28 = vld [vmem:[%s971_s7 + $0x8] sm:$0xff]  ;;  %v119_v29 = vsel %vm99_vm0, %v57_v22, 0  ;;  %v56_v30 = vpack.c.bf16 %v44_v27, %v43_v26  ;;  %v429_v31 = vld [vmem:[%s973_s9] sm:$0xff]  ;;  %v191_v33 = vld [vmem:[%s971_s7 + $0x10] sm:$0xff] }
  0x12   :  { %v430_v32 = vld [vmem:[%s973_s9 + $0x8] sm:$0xff]  ;;  %v41_v34 = vld [vmem:[%s964_s0 + $0x20] sm:$0xff]  ;;  %v431_v36 = vld [vmem:[%s973_s9 + $0x10] sm:$0xff] }
  0x13   :  { %317 = vperm.xlu1 %665, %v307_v24   ;;  %v42_v35 = vld [vmem:[%s964_s0 + $0x28] sm:$0xff]  ;;  %v116_v37 = vsel %vm99_vm0, %v56_v30, 0  ;;  %v192_v39 = vld [vmem:[%s971_s7 + $0x18] sm:$0xff]  ;;  %v39_v41 = vld [vmem:[%s964_s0 + $0x10] sm:$0xff] }
  0x14   :  { %v55_v38 = vpack.c.bf16 %v42_v35, %v41_v34  ;;  %v432_v40 = vld [vmem:[%s973_s9 + $0x18] sm:$0xff]  ;;  %v37_v45 = vld [vmem:[%s964_s0] sm:$0xff]  ;;  %v38_v46 = vld [vmem:[%s964_s0 + $0x8] sm:$0xff] }
  0x15   :  { %595 = vmatpush3.bf16.xpose.msra.mxu0 %v122_v21  ;;  %195 = vperm.xlu0 %664, %v189_v25   ;;  %v40_v42 = vld [vmem:[%s964_s0 + $0x18] sm:$0xff]  ;;  %v53_v48 = vpack.c.bf16 %v38_v46, %v37_v45  ;;  %v667_v50 = vld [vmem:[%s966_s2 + $0x8] sm:$0xff]   ;;  %v668_v51 = vld [vmem:[%s967_s3] sm:$0xff]  }
  0x16   :  { %649 = vmatprep.subr.msk.bf16.mxu0 %vm99_vm0, %v57_v22  ;;  %v113_v43 = vsel %vm99_vm0, %v55_v38, 0  ;;  %v54_v44 = vpack.c.bf16 %v40_v42, %v39_v41  ;;  %614 = vmatprep.mubr.msk.bf16.mxu1 %vm99_vm0, %v668_v51  ;;  %v292_v5 = vld [vmem:[%s965_s1 + $0x70] sm:$0xff]  ;;  %v293_v6 = vld [vmem:[%s965_s1 + $0x78] sm:$0xff]  ;;  %v290_v9 = vld [vmem:[%s965_s1 + $0x60] sm:$0xff] }
  0x17   :  { %200 = vperm.xlu1 %665, %v190_v28   ;;  %v107_v49 = vsel %vm99_vm0, %v53_v48, 0  ;;  %v301_v8 = vpack.c.bf16 %v293_v6, %v292_v5  ;;  %v291_v10 = vld [vmem:[%s965_s1 + $0x68] sm:$0xff]  ;;  %v670_v12 = vld [vmem:[%s968_s4] sm:$0xff]   ;;  %v288_v15 = vld [vmem:[%s965_s1 + $0x50] sm:$0xff] }
  0x18   :  { %v110_v47 = vsel %vm99_vm0, %v54_v44, 0  ;;  %v669_v11 = vld [vmem:[%s967_s3 + $0x8] sm:$0xff]   ;;  %v300_v14 = vpack.c.bf16 %v291_v10, %v290_v9  ;;  %v289_v16 = vld [vmem:[%s965_s1 + $0x58] sm:$0xff]  ;;  %v286_v19 = vld [vmem:[%s965_s1 + $0x40] sm:$0xff] }
  0x19   :  { %435 = vperm.xlu0 %664, %v429_v31   ;;  %v368_v13 = vsel %vm99_vm0, %v301_v8, 0  ;;  %v299_v18 = vpack.c.bf16 %v289_v16, %v288_v15  ;;  %v287_v20 = vld [vmem:[%s965_s1 + $0x48] sm:$0xff]  ;;  %v284_v23 = vld [vmem:[%s965_s1 + $0x30] sm:$0xff]  ;;  %v285_v24 = vld [vmem:[%s965_s1 + $0x38] sm:$0xff] }
  0x1a   :  { %v365_v17 = vsel %vm99_vm0, %v300_v14, 0  ;;  %v298_v22 = vpack.c.bf16 %v287_v20, %v286_v19  ;;  %v297_v26 = vpack.c.bf16 %v285_v24, %v284_v23  ;;  %v282_v27 = vld [vmem:[%s965_s1 + $0x20] sm:$0xff]  ;;  %v283_v28 = vld [vmem:[%s965_s1 + $0x28] sm:$0xff]  ;;  %v280_v31 = vld [vmem:[%s965_s1 + $0x10] sm:$0xff] }
  0x1b   :  { %440 = vperm.xlu1 %665, %v430_v32   ;;  %v362_v21 = vsel %vm99_vm0, %v299_v18, 0  ;;  %v281_v32 = vld [vmem:[%s965_s1 + $0x18] sm:$0xff]  ;;  %v278_v35 = vld [vmem:[%s965_s1] sm:$0xff] }
  0x1c   :  { %v359_v25 = vsel %vm99_vm0, %v298_v22, 0  ;;  %v295_v34 = vpack.c.bf16 %v281_v32, %v280_v31  ;;  %v672_v41 = vld [vmem:[%s969_s5] sm:$0xff]  }
  0x1d   :  { %597 = vmatpush3.bf16.xpose.msra.mxu0 %v119_v29  ;;  %205 = vperm.xlu0 %664, %v191_v33   ;;  %v356_v29 = vsel %vm99_vm0, %v297_v26, 0 }
  0x1e   :  { %650 = vmatprep.subr.msk.bf16.mxu0 %vm99_vm0, %v56_v30  ;;  %v296_v30 = vpack.c.bf16 %v283_v28, %v282_v27 }
  0x1f   :  { %445 = vperm.xlu1 %665, %v431_v36   ;;  %v279_v36 = vld [vmem:[%s965_s1 + $0x8] sm:$0xff] }
  0x20   :  { %v353_v33 = vsel %vm99_vm0, %v296_v30, 0 }
  0x21   :  { %210 = vperm.xlu0 %664, %v192_v39  }
  0x23   :  { %450 = vperm.xlu1 %665, %v432_v40   ;;  %v671_v40 = vld [vmem:[%s968_s4 + $0x8] sm:$0xff]  }
  0x25   :  { %599 = vmatpush3.bf16.xpose.msra.mxu0 %v116_v37  ;;  %v350_v37 = vsel %vm99_vm0, %v295_v34, 0 }
  0x26   :  { %651 = vmatprep.subr.msk.bf16.mxu0 %vm99_vm0, %v55_v38  ;;  %v294_v38 = vpack.c.bf16 %v279_v36, %v278_v35 }
  0x28   :  { %v347_v39 = vsel %vm99_vm0, %v294_v38, 0 }
  0x2d   :  { %601 = vmatpush3.bf16.xpose.msra.mxu0 %v113_v43 }
  0x2e   :  { %652 = vmatprep.subr.msk.bf16.mxu0 %vm99_vm0, %v54_v44 }
  0x35   :  { %603 = vmatpush3.bf16.xpose.msra.mxu0 %v110_v47 }
  0x36   :  { %653 = vmatprep.subr.msk.bf16.mxu0 %vm99_vm0, %v53_v48 }
  0x3d   :  { %605 = vmatpush3.bf16.xpose.msra.mxu0 %v107_v49 }
  0x44   :  { %607 = vmatmul.mubr.msk.bf16.vlgmr.msra.gmra.mxu0 %vm99_vm0, %v667_v50 }
  0x45   :  { %642 = vmatprep.mubr.msk.bf16.mxu0 %vm99_vm0, %v672_v41 }
  0x80   :  { %v82_v52 = vpop.permute.xlu0 %81 }
  0x81   :  { %v72_v53 = vpop.permute.xlu1 %71 }
  0x84   :  { %v87_v57 = vpop.permute.xlu0 %86 }
  0x85   :  { %v77_v61 = vpop.permute.xlu1 %76 }
  0x88   :  { %v323_v45 = vpop.permute.xlu0 %322 }
  0x8a   :  { %v328_v47 = vpop.permute.xlu1 %327 }
  0x8c   :  { %v313_v51 = vpop.permute.xlu0 %312 }
 0x104   :  { %v608_v54 = vpop.f32.mrf.mxu0 }
 0x105   :  { %v173_v56 = vadd.f32 %v608_v54, %v82_v52 }
 0x106   :  { %v164_v55 = vpop.f32.mrf.mxu0 }
 0x107   :  { %v165_v59 = vadd.f32 %v164_v55, %v72_v53  ;;  %v181_v63 = vmax.f32 %v173_v56, 0.0  ;;  %v318_v55 = vpop.permute.xlu1 %317 }
 0x108   :  { %v609_v58 = vpop.f32.mrf.mxu0 }
 0x109   :  { %v176_v60 = vadd.f32 %v609_v58, %v87_v57  ;;  %v179_v2 = vmax.f32 %v165_v59, 0.0 }
 0x10a   :  { %v167_v62 = vpop.f32.mrf.mxu0 }
 0x10b   :  { %v182_v0 = vmax.f32 %v176_v60, 0.0  ;;  %v168_v1 = vadd.f32 %v167_v62, %v77_v61 }
 0x10d   :  { %v180_v3 = vmax.f32 %v168_v1, 0.0  ;;  %v184_v4 = vpack.c.bf16 %v182_v0, %v181_v63  ;;  %v673_v0 = vld [vmem:[%s969_s5 + $0x8] sm:$0xff]   ;;  %v201_v1 = vpop.permute.xlu1 %200  ;;  %s697_s5 = smov [#allocation2]  }
 0x10e   :  { %s538_s27 = sshll.u32 %s697_s5, 4  ;;  %s539_s27 = int_to_ptr.vmem [resolvable:$true] %s538_s27 }
 0x10f   :  { %v183_v7 = vpack.c.bf16 %v180_v3, %v179_v2  ;;  %610 = vmatprep.subr.bf16.mxu1 %v184_v4  ;;  %v196_v2 = vpop.permute.xlu0 %195  ;;  %s674_s3 = scalar_lea.vmem %s539_s27, 16  ;;  %s678_s28 = scalar_lea.vmem %s539_s27, 32 }
 0x110   :  { %611 = vmatpush3.bf16.msra.mxu1 %v184_v4  ;;  %p675_p0 = scmp.ne.s32.totalorder %s539_s27, %s674_s3  ;;  %p679_p1 = scmp.lt.s32.totalorder %s539_s27, %s539_s27 }
 0x111   :  { %612 = vmatprep.subr.bf16.mxu1 %v183_v7  ;;  %v441_v3 = vpop.permute.xlu1 %440  ;;  %p680_p2 = scmp.lt.s32.totalorder %s678_s28, %s674_s3 }
 0x113   :  { %v436_v4 = vpop.permute.xlu0 %435  ;;  %p681_p3 = por %p680_p2, %p679_p1 }
 0x114   :  { %613 = vmatpush3.bf16.msra.mxu1 %v183_v7 }
 0x115   :  { %654 = vmatprep.subr.msk.bf16.mxu1 %vm99_vm0, %v301_v8  ;;  %v446_v6 = vpop.permute.xlu1 %445  ;;  %p682_p4 = pnand %p681_p3, %p675_p0 }
 0x117   :  { %615 = vmatmul.mubr.msk.bf16.vlgmr.msra.gmra.mxu1 %vm99_vm0, %v669_v11  ;;  %v206_v8 = vpop.permute.xlu0 %205 }
 0x118   :  { %619 = vmatpush3.bf16.xpose.msra.mxu1 %v368_v13  ;;  %634 = vmatprep.mubr.msk.bf16.mxu1 %vm99_vm0, %v670_v12 }
 0x119   :  { %655 = vmatprep.subr.msk.bf16.mxu1 %vm99_vm0, %v300_v14  ;;  %v451_v16 = vpop.permute.xlu1 %450 }
 0x120   :  { %621 = vmatpush3.bf16.xpose.msra.mxu1 %v365_v17 }
 0x121   :  { %656 = vmatprep.subr.msk.bf16.mxu1 %vm99_vm0, %v299_v18 }
 0x128   :  { %623 = vmatpush3.bf16.xpose.msra.mxu1 %v362_v21  ;;  %v211_v21 = vpop.permute.xlu0 %210 }
 0x129   :  { %657 = vmatprep.subr.msk.bf16.mxu1 %vm99_vm0, %v298_v22 }
 0x130   :  { %625 = vmatpush3.bf16.xpose.msra.mxu1 %v359_v25 }
 0x131   :  { %658 = vmatprep.subr.msk.bf16.mxu1 %vm99_vm0, %v297_v26 }
 0x138   :  { %627 = vmatpush3.bf16.xpose.msra.mxu1 %v356_v29 }
 0x139   :  { %659 = vmatprep.subr.msk.bf16.mxu1 %vm99_vm0, %v296_v30 }
 0x140   :  { %629 = vmatpush3.bf16.xpose.msra.mxu1 %v353_v33 }
 0x141   :  { %660 = vmatprep.subr.msk.bf16.mxu1 %vm99_vm0, %v295_v34 }
 0x148   :  { %631 = vmatpush3.bf16.xpose.msra.mxu1 %v350_v37 }
 0x149   :  { %661 = vmatprep.subr.msk.bf16.mxu1 %vm99_vm0, %v294_v38 }
 0x150   :  { %633 = vmatpush3.bf16.xpose.msra.mxu1 %v347_v39 }
 0x157   :  { %635 = vmatmul.mubr.msk.bf16.vlgmr.msra.gmra.mxu1 %vm99_vm0, %v671_v40 }
 0x1d7   :  { %v616_v42 = vpop.f32.mrf.mxu1 }
 0x1d8   :  { %v272_v17 = vadd.f32 %v616_v42, %v206_v8 }
 0x1d9   :  { %v263_v43 = vpop.f32.mrf.mxu1 }
 0x1da   :  { %v264_v12 = vadd.f32 %v263_v43, %v196_v2 }
 0x1db   :  { %v617_v44 = vpop.f32.mrf.mxu1 }
 0x1dc   :  { %v275_v22 = vadd.f32 %v617_v44, %v211_v21 }
 0x1dd   :  { %v266_v46 = vpop.f32.mrf.mxu1 }
 0x1de   :  { %v267_v13 = vadd.f32 %v266_v46, %v201_v1 }
 0x217   :  { %v636_v48 = vpop.f32.mrf.mxu1 }
 0x218   :  { %v413_v50 = vadd.f32 %v636_v48, %v323_v45 }
 0x219   :  { %v404_v49 = vpop.f32.mrf.mxu1 }
 0x21a   :  { %v405_v53 = vadd.f32 %v404_v49, %v313_v51  ;;  %v421_v57 = vmax.f32 %v413_v50, 0.0 }
 0x21b   :  { %v637_v52 = vpop.f32.mrf.mxu1 }
 0x21c   :  { %v416_v54 = vadd.f32 %v637_v52, %v328_v47  ;;  %v419_v60 = vmax.f32 %v405_v53, 0.0 }
 0x21d   :  { %v407_v56 = vpop.f32.mrf.mxu1 }
 0x21e   :  { %v422_v58 = vmax.f32 %v416_v54, 0.0  ;;  %v408_v59 = vadd.f32 %v407_v56, %v318_v55 }
 0x220   :  { %v424_v61 = vpack.c.bf16 %v422_v58, %v421_v57  ;;  %v420_v62 = vmax.f32 %v408_v59, 0.0 }
 0x222   :  { %v423_v63 = vpack.c.bf16 %v420_v62, %v419_v60  ;;  %638 = vmatprep.subr.bf16.mxu0 %v424_v61 }
 0x223   :  { %639 = vmatpush3.bf16.msra.mxu0 %v424_v61 }
 0x224   :  { %640 = vmatprep.subr.bf16.mxu0 %v423_v63 }
 0x227   :  { %641 = vmatpush3.bf16.msra.mxu0 %v423_v63 }
 0x22a   :  { %643 = vmatmul.mubr.msk.bf16.vlgmr.msra.gmra.mxu0 %vm99_vm0, %v673_v0 }
 0x2ea   :  { %v644_v5 = vpop.f32.mrf.mxu0 }
 0x2eb   :  { %v512_v14 = vadd.f32 %v644_v5, %v446_v6 }
 0x2ec   :  { %v503_v7 = vpop.f32.mrf.mxu0 }
 0x2ed   :  { %v504_v10 = vadd.f32 %v503_v7, %v436_v4  ;;  %v520_v23 = vmul.f32 %v512_v14, %v272_v17 }
 0x2ee   :  { %v645_v9 = vpop.f32.mrf.mxu0 }
 0x2ef   :  { %v518_v18 = vmul.f32 %v504_v10, %v264_v12  ;;  %v515_v19 = vadd.f32 %v645_v9, %v451_v16 }
 0x2f0   :  { %v506_v11 = vpop.f32.mrf.mxu0 }
 0x2f1   :  { %v507_v15 = vadd.f32 %v506_v11, %v441_v3  ;;  %v521_v25 = vmul.f32 %v515_v19, %v275_v22 }
 0x2f3   :  { %v519_v20 = vmul.f32 %v507_v15, %v267_v13 }
 0x2f5   :  { %v522_v24 = vadd.f32 %v519_v20, %v518_v18 }
 0x2f7   :  { %v523_v26 = vadd.f32 %v522_v24, %v520_v23 }
 0x2f9   :  { %v524_v27 = vadd.f32 %v523_v26, %v521_v25 }
 0x2fb   :  { %v525_v28 = vrot.slane %v524_v27, 4 }
 0x2fd   :  { %v526_v29 = vadd.f32 %v525_v28, %v524_v27 }
 0x2ff   :  { %v527_v30 = vrot.slane %v526_v29, 2 }
 0x301   :  { %v528_v31 = vadd.f32 %v527_v30, %v526_v29 }
 0x303   :  { %v529_v32 = vrot.slane %v528_v31, 1 }
 0x305   :  { %v530_v33 = vadd.f32 %v529_v32, %v528_v31 }
 0x307   :  { %531 = vst [vmem:[#allocation2] sm:$0x1] %v530_v33 }
 0x308   :  { %685 = shalt.err (!%p682_p4)
}
 0x309   :  { %541 = dma.vmem_to_hbm [thread:$0]  %s539_s27, 16, %s974_s10, [#allocation3]  }
 0x30a   :  { %694 = dma.done.wait [#allocation3], 16  }
 0x30b   :  { %695 = vsyncadd [#allocation3], 4294967280 }
 0x30c   :  { %545 = vsyncpa [#allocation3], 1 }

</bundles_post_ra>
